<compile_context>
chip_gen: v7x
topology: tpu7x:2x2x1
jax: 0.10.0
libtpu: 0.0.40
codegen_flags: <defaults>
</compile_context>

<pallas_src>
import math

import jax
import jax.numpy as jnp
from jax.experimental import pallas as pl
from jax.experimental.pallas import tpu as pltpu


def _round_up(x: int, m: int) -> int:
    return ((x + m - 1) // m) * m


# ----------------------------------------------------------------------------
# Kernel 1: inner-model forward  (MAML.forward -> self.module(x))
#   y = relu(x @ W1 + b1) @ W2 + b2
# Batched over task-stacked rows; weights stay resident in VMEM across tiles.
# ----------------------------------------------------------------------------
def _mlp_forward_kernel(x_ref, w1_ref, b1_ref, w2_ref, b2_ref, o_ref):
    x = x_ref[...]
    h = jnp.dot(x, w1_ref[...], preferred_element_type=jnp.float32)
    h = h + b1_ref[...]                      # (1, H) broadcasts over batch rows
    h = jnp.maximum(h, 0.0)                  # ReLU on the VPU (f32 epilogue)
    y = jnp.dot(h, w2_ref[...], preferred_element_type=jnp.float32)
    y = y + b2_ref[...]
    o_ref[...] = y.astype(o_ref.dtype)


def mlp_forward(x, w1, b1, w2, b2, *, tile_m=128):
    """Forward pass of the wrapped module over a task-stacked batch."""
    B, D_in = x.shape
    H = w1.shape[1]
    O = w2.shape[1]

    tm = min(tile_m, B)
    assert B % tm == 0, "stacked task batch must be a multiple of the row tile"
    grid = (B // tm,)

    return pl.pallas_call(
        _mlp_forward_kernel,
        out_shape=jax.ShapeDtypeStruct((B, O), jnp.float32),
        grid_spec=pltpu.PrefetchScalarGridSpec(
            num_scalar_prefetch=0,
            grid=grid,
            in_specs=[
                pl.BlockSpec((tm, D_in), lambda i: (i, 0)),   # batch tile
                pl.BlockSpec((D_in, H), lambda i: (0, 0)),    # resident weight
                pl.BlockSpec((1, H), lambda i: (0, 0)),       # resident bias
                pl.BlockSpec((H, O), lambda i: (0, 0)),       # resident weight
                pl.BlockSpec((1, O), lambda i: (0, 0)),       # resident bias
            ],
            out_specs=pl.BlockSpec((tm, O), lambda i: (i, 0)),
        ),
        compiler_params=pltpu.CompilerParams(
            dimension_semantics=("parallel",)),
    )(x, w1, b1, w2, b2)


# ----------------------------------------------------------------------------
# Kernel 2: fused MAML._Adam over ALL parameters at once (single step, t = 1).
# With t = 1 the bias correction cancels exactly:
#   m_cap = g,  sqrt(v_cap) = |g|   =>   p <- p - alpha * g / (|g| + eps)
# Parameters/grads are flattened into one lane-dense [rows, 128] buffer and
# updated by one tiled, pipelined launch; alpha lives in SMEM.
# ----------------------------------------------------------------------------
def _fused_adam_kernel(p_ref, g_ref, alpha_ref, o_ref):
    epsilon = 1e-08
    alpha = alpha_ref[0]                     # scalar read from SMEM (~free)
    g = g_ref[...]
    # Exact simplification of the t=1 Adam chain (no sqrt, no bias-correct divs).
    o_ref[...] = (p_ref[...] - alpha * g / (jnp.abs(g) + epsilon)).astype(
        o_ref.dtype
    )


def fused_adam(params, grads, alpha, *, lane=128, row_tile=512):
    """One Pallas launch applying MAML._Adam to every parameter tensor."""
    assert len(params) == len(grads)
    shapes = [p.shape for p in params]
    sizes = [math.prod(s) for s in shapes]
    n = sum(sizes)

    flat_p = jnp.concatenate([p.reshape(-1) for p in params])
    flat_g = jnp.concatenate([g.reshape(-1) for g in grads])

    # Lane-dense layout: [rows, 128], rows padded to a multiple of the row tile.
    rows = _round_up(pl.cdiv(n, lane), 8)
    tr = min(row_tile, rows)
    rows = _round_up(rows, tr)
    padded = rows * lane

    flat_p = jnp.pad(flat_p, (0, padded - n))
    flat_g = jnp.pad(flat_g, (0, padded - n))   # grad=0 on pad => param unchanged
    p2 = flat_p.reshape(rows, lane)
    g2 = flat_g.reshape(rows, lane)
    alpha_arr = jnp.asarray([alpha], dtype=jnp.float32)   # SMEM scalar, no recompile

    out = pl.pallas_call(
        _fused_adam_kernel,
        out_shape=jax.ShapeDtypeStruct((rows, lane), jnp.float32),
        grid_spec=pltpu.PrefetchScalarGridSpec(
            num_scalar_prefetch=0,
            grid=(rows // tr,),
            in_specs=[
                pl.BlockSpec((tr, lane), lambda i: (i, 0)),
                pl.BlockSpec((tr, lane), lambda i: (i, 0)),
                pl.BlockSpec(memory_space=pltpu.MemorySpace.SMEM),
            ],
            out_specs=pl.BlockSpec((tr, lane), lambda i: (i, 0)),
        ),
        input_output_aliases={0: 0},   # update params in place (alias p2 -> out)
        compiler_params=pltpu.CompilerParams(
            dimension_semantics=("parallel",)),
    )(p2, g2, alpha_arr)

    # Unflatten back to the original parameter shapes.
    updated_flat = out.reshape(-1)[:n]
    updated, off = [], 0
    for s, sz in zip(shapes, sizes):
        updated.append(updated_flat[off:off + sz].reshape(s))
        off += sz
    return updated


# ----------------------------------------------------------------------------
# Reference implementations (plain JAX) for verification.
# ----------------------------------------------------------------------------
def mlp_forward_ref(x, w1, b1, w2, b2):
    h = jnp.maximum(x @ w1 + b1, 0.0)
    return h @ w2 + b2


def adam_step_ref(param, grad, alpha):
    beta_1, beta_2, eps = 0.9, 0.999, 1e-08
    m_cap = (1 - beta_1) * grad / (1 - beta_1)
    v_cap = (1 - beta_2) * grad ** 2 / (1 - beta_2)
    return param - alpha * m_cap / (jnp.sqrt(v_cap) + eps)


if __name__ == "__main__":
    key = jax.random.PRNGKey(0)
    k_x, k_w1, k_b1, k_w2, k_b2, k_t = jax.random.split(key, 6)

    # Inner-model shapes (small), with the MAML task batch stacked so the
    # matmul M-dimension is 128-aligned: 32 tasks x 8 examples = 256 rows.
    num_tasks, per_task = 32, 8
    B = num_tasks * per_task                      # 256
    D_in, H, D_out = 32, 64, 32
    lr = 0.01

    x = jax.random.normal(k_x, (B, D_in), dtype=jnp.float32)
    w1 = jax.random.normal(k_w1, (D_in, H), dtype=jnp.float32) * 0.1
    b1 = jax.random.normal(k_b1, (1, H), dtype=jnp.float32) * 0.1
    w2 = jax.random.normal(k_w2, (H, D_out), dtype=jnp.float32) * 0.1
    b2 = jax.random.normal(k_b2, (1, D_out), dtype=jnp.float32) * 0.1
    target = jax.random.normal(k_t, (B, D_out), dtype=jnp.float32)

    # --- forward pass (MAML.forward -> module(x)) over the stacked task batch ---
    y = mlp_forward(x, w1, b1, w2, b2)
    jax.block_until_ready(y)
    y_ref = mlp_forward_ref(x, w1, b1, w2, b2)
    assert jnp.allclose(y, y_ref, atol=1e-5, rtol=1e-5), "forward mismatch"

    # --- inner-loop gradients ---
    # TODO(synk): MAML.adapt() calls torch.autograd.grad; gradient computation
    # is left to jax.grad outside the kernel (only forward + Adam are kernels).
    def loss_fn(params, xb, tgt):
        w1_, b1_, w2_, b2_ = params
        pred = mlp_forward_ref(xb, w1_, b1_, w2_, b2_)
        return jnp.mean((pred - tgt) ** 2)

    params = [w1, b1, w2, b2]
    grads = list(jax.grad(loss_fn)(tuple(params), x, target))

    # --- single fused Adam launch over every parameter (MAML._Adam, t=1) ---
    new_params = fused_adam(params, grads, lr)
    jax.block_until_ready(new_params)

    for p, g, p_new in zip(params, grads, new_params):
        p_ref = adam_step_ref(p, g, lr)
        assert jnp.allclose(p_new, p_ref, atol=1e-5, rtol=1e-5), "adam mismatch"

    print("KERNEL_OK")
</pallas_src>

<mosaic_0001>
module attributes {stable_mosaic.version = 11 : i64} {
  func.func @_mlp_forward_kernel(%arg0: i32, %arg1: memref<128x32xf32, #tpu.memory_space<vmem>>, %arg2: memref<32x64xf32, #tpu.memory_space<vmem>>, %arg3: memref<1x64xf32, #tpu.memory_space<vmem>>, %arg4: memref<64x32xf32, #tpu.memory_space<vmem>>, %arg5: memref<1x32xf32, #tpu.memory_space<vmem>>, %arg6: memref<128x32xf32, #tpu.memory_space<vmem>>) attributes {dimension_semantics = [#tpu.dimension_semantics<parallel>], iteration_bounds = array<i64: 2>, scalar_prefetch = 0 : i64, scratch_operands = 0 : i64, tpu.core_type = #tpu.core_type<tc>, window_params = [{transform_indices = @transform_0, window_bounds = array<i64: 128, 32>}, {pipeline_mode = #tpu.pipeline_mode<synchronous>, transform_indices = @transform_1, window_bounds = array<i64: 32, 64>}, {pipeline_mode = #tpu.pipeline_mode<synchronous>, transform_indices = @transform_2, window_bounds = array<i64: 1, 64>}, {pipeline_mode = #tpu.pipeline_mode<synchronous>, transform_indices = @transform_3, window_bounds = array<i64: 64, 32>}, {pipeline_mode = #tpu.pipeline_mode<synchronous>, transform_indices = @transform_4, window_bounds = array<i64: 1, 32>}, {transform_indices = @transform_5, window_bounds = array<i64: 128, 32>}]} {
    %c0 = arith.constant 0 : index
    %c0_0 = arith.constant 0 : index
    %0 = vector.load %arg1[%c0, %c0_0] : memref<128x32xf32, #tpu.memory_space<vmem>>, vector<128x32xf32>
    %c0_1 = arith.constant 0 : index
    %c0_2 = arith.constant 0 : index
    %1 = vector.load %arg2[%c0_1, %c0_2] : memref<32x64xf32, #tpu.memory_space<vmem>>, vector<32x64xf32>
    %cst = arith.constant dense<0.000000e+00> : vector<128x64xf32>
    %2 = tpu.matmul %0, %1, %cst {dimension_numbers = #tpu.dot_dimension_numbers<[1], [0], [0], [1], [0, 0, 1, 1], [], []>} : vector<128x32xf32>, vector<32x64xf32>, vector<128x64xf32> -> vector<128x64xf32>
    %c0_3 = arith.constant 0 : index
    %c0_4 = arith.constant 0 : index
    %3 = vector.load %arg3[%c0_3, %c0_4] : memref<1x64xf32, #tpu.memory_space<vmem>>, vector<1x64xf32>
    %4 = vector.broadcast %3 : vector<1x64xf32> to vector<128x64xf32>
    %5 = arith.addf %2, %4 : vector<128x64xf32>
    %cst_5 = arith.constant 0.000000e+00 : f32
    %6 = vector.broadcast %cst_5 : f32 to vector<128x64xf32>
    %7 = arith.maximumf %5, %6 : vector<128x64xf32>
    %c0_6 = arith.constant 0 : index
    %c0_7 = arith.constant 0 : index
    %8 = vector.load %arg4[%c0_6, %c0_7] : memref<64x32xf32, #tpu.memory_space<vmem>>, vector<64x32xf32>
    %cst_8 = arith.constant dense<0.000000e+00> : vector<128x32xf32>
    %9 = tpu.matmul %7, %8, %cst_8 {dimension_numbers = #tpu.dot_dimension_numbers<[1], [0], [0], [1], [0, 0, 1, 1], [], []>} : vector<128x64xf32>, vector<64x32xf32>, vector<128x32xf32> -> vector<128x32xf32>
    %c0_9 = arith.constant 0 : index
    %c0_10 = arith.constant 0 : index
    %10 = vector.load %arg5[%c0_9, %c0_10] : memref<1x32xf32, #tpu.memory_space<vmem>>, vector<1x32xf32>
    %11 = vector.broadcast %10 : vector<1x32xf32> to vector<128x32xf32>
    %12 = arith.addf %9, %11 : vector<128x32xf32>
    %c0_11 = arith.constant 0 : index
    %c0_12 = arith.constant 0 : index
    %13 = vector.load %arg6[%c0_11, %c0_12] : memref<128x32xf32, #tpu.memory_space<vmem>>, vector<128x32xf32>
    tpu.vector_store %arg6[%c0_11, %c0_12], %12 {strides = array<i32>} : memref<128x32xf32, #tpu.memory_space<vmem>>, vector<128x32xf32>,
    return
  }
  func.func @transform_0(%arg0: i32) -> (i32, i32) {
    %c0_i32 = arith.constant 0 : i32
    %c0_i32_0 = arith.constant 0 : i32
    return %arg0, %c0_i32 : i32, i32
  }
  func.func @transform_1(%arg0: i32) -> (i32, i32) {
    %c0_i32 = arith.constant 0 : i32
    %c0_i32_0 = arith.constant 0 : i32
    %c0_i32_1 = arith.constant 0 : i32
    return %c0_i32, %c0_i32_0 : i32, i32
  }
  func.func @transform_2(%arg0: i32) -> (i32, i32) {
    %c0_i32 = arith.constant 0 : i32
    %c0_i32_0 = arith.constant 0 : i32
    %c0_i32_1 = arith.constant 0 : i32
    return %c0_i32, %c0_i32_0 : i32, i32
  }
  func.func @transform_3(%arg0: i32) -> (i32, i32) {
    %c0_i32 = arith.constant 0 : i32
    %c0_i32_0 = arith.constant 0 : i32
    %c0_i32_1 = arith.constant 0 : i32
    return %c0_i32, %c0_i32_0 : i32, i32
  }
  func.func @transform_4(%arg0: i32) -> (i32, i32) {
    %c0_i32 = arith.constant 0 : i32
    %c0_i32_0 = arith.constant 0 : i32
    %c0_i32_1 = arith.constant 0 : i32
    return %c0_i32, %c0_i32_0 : i32, i32
  }
  func.func @transform_5(%arg0: i32) -> (i32, i32) {
    %c0_i32 = arith.constant 0 : i32
    %c0_i32_0 = arith.constant 0 : i32
    return %arg0, %c0_i32 : i32, i32
  }
}

</mosaic_0001>

<bundles_post_ra>
// kernel: tpu_custom_call.1
= control target key start
LH: loop header
LB: loop body
LE: loop exit
PB: predicated region body
PF: predicated region fallthrough
CT: control target
= control target key end

     0   :  { %s985_s18 = smov 0   ;;  %s1135_s0 = inlined_call_operand.vmem [shape: f32[256,32], index: 0, kind: input, shape index: {}]   ;;  %s1136_s1 = inlined_call_operand.vmem [shape: f32[32,64], index: 1, kind: input, shape index: {}]   ;;  %s1137_s2 = inlined_call_operand.vmem [shape: f32[1,64], index: 2, kind: input, shape index: {}]   ;;  %s1138_s3 = inlined_call_operand.vmem [shape: f32[64,32], index: 3, kind: input, shape index: {}]   ;;  %s1139_s4 = inlined_call_operand.vmem [shape: f32[1,32], index: 4, kind: input, shape index: {}]   ;;  %s1140_s5 = inlined_call_operand.vmem [shape: f32[256,32], index: 5, kind: output, shape index: {}]  }
   0x1 LB: > { %s746_s19 = sadd.s32 4294967295, %s953_s18   ;;  %p750_p0 = scmp.ge.s32.totalorder %s953_s18, 1  ;;  %s953_s18 = sphi %s985_s18, %s15_s18  }
   0x2   : > { %p188_p1 = scmp.lt.s32.totalorder %s953_s18, 3 }
   0x4   : > { %p189_p2 = pnand %p750_p0, %p188_p1 }
   0x5   : > { %v244_v0 = vld [vmem:[%s1136_s1] sm:$0xff] (!%p189_p2)  ;;  %v245_v1 = vld [vmem:[%s1136_s1 + $0x8] sm:$0xff] (!%p189_p2)  ;;  %v246_v2 = vld [vmem:[%s1136_s1 + $0x10] sm:$0xff] (!%p189_p2)  ;;  %s751_s26 = sshll.u32 (!%p189_p2), %s746_s19, 4  ;;  %vm255_vm0 = vcmask (!%p189_p2), 261120   ;;  %vm480_vm1 = vcmask (!%p189_p2), 523264  }
   0x6   : > { %192 = sbr.rel (%p189_p2) target bundleno = 480 (0x1e0), region = 40  ;;  %v907_v3 = vpack.c.bf16 (!%p189_p2), %v245_v1, %v244_v0  ;;  %v247_v4 = vld [vmem:[%s1136_s1 + $0x18] sm:$0xff] (!%p189_p2)  ;;  %p217_p3 = scmp.lt.s32.totalorder (!%p189_p2), %s751_s26, 31  ;;  %v465_v5 = vld [vmem:[%s1138_s3] sm:$0xff] (!%p189_p2)  ;;  %v466_v6 = vld [vmem:[%s1138_s3 + $0x8] sm:$0xff] (!%p189_p2) }
   0x7   : > { %v911_v7 = vpack.c.bf16 (!%p189_p2), %v247_v4, %v246_v2  ;;  %v915_v8 = vpack.c.bf16 (!%p189_p2), %v466_v6, %v465_v5  ;;  %v467_v9 = vld [vmem:[%s1138_s3 + $0x10] sm:$0xff] (!%p189_p2)  ;;  %v468_v10 = vld [vmem:[%s1138_s3 + $0x18] sm:$0xff] (!%p189_p2)  ;;  %v469_v12 = vld [vmem:[%s1138_s3 + $0x20] sm:$0xff] (!%p189_p2) }
   0x8   : > { %908 = vmatprep.subr.bf16.mxu0 (!%p189_p2), %v907_v3  ;;  %v919_v11 = vpack.c.bf16 (!%p189_p2), %v468_v10, %v467_v9  ;;  %v470_v13 = vld [vmem:[%s1138_s3 + $0x28] sm:$0xff] (!%p189_p2)  ;;  %v471_v31 = vld [vmem:[%s1138_s3 + $0x30] sm:$0xff] (!%p189_p2)  ;;  %v472_v32 = vld [vmem:[%s1138_s3 + $0x38] sm:$0xff] (!%p189_p2) }
   0x9   : > { %910 = vmatpush3.bf16.msra.mxu0 (!%p189_p2), %v907_v3  ;;  %931 = vmatprep.subr.bf16.mxu1 (!%p189_p2), %v915_v8  ;;  %v923_v16 = vpack.c.bf16 (!%p189_p2), %v470_v13, %v469_v12  ;;  %v927_v33 = vpack.c.bf16 (!%p189_p2), %v472_v32, %v471_v31  ;;  %v755_v34 = vld [vmem:[%s1137_s2] ss:$0 sm:$0xff] (!%p189_p2) }
   0xa   : > { %912 = vmatprep.subr.bf16.mxu0 (!%p189_p2), %v911_v7  ;;  %935 = vmatpush3.bf16.msra.mxu1 (!%p189_p2), %v915_v8 }
   0xb   : > { %932 = vmatprep.subr.bf16.mxu1 (!%p189_p2), %v919_v11 }
   0xd   : > { %s1142_s26 = smov (!%p217_p3, %s751_s26), 31  ;;  %914 = vmatpush3.bf16.msra.mxu0 %v911_v7 }
   0xe   : > { %s752_s12 = sshll.u32 %s1142_s26, 3  ;;  %916 = vmatprep.subr.bf16.mxu0 %v915_v8  ;;  %936 = vmatpush3.bf16.msra.mxu1 %v919_v11 }
   0xf   : > { %s1031_s20 = scalar_lea.vmem %s1135_s0, %s752_s12  ;;  %933 = vmatprep.subr.bf16.mxu1 %v923_v16  ;;  %s1098_s7 = scalar_lea.vmem %s1140_s5, %s752_s12 }
  0x10   : > { %v228_v14 = vld [vmem:[%s1031_s20] sm:$0xff]  ;;  %v229_v15 = vld [vmem:[%s1031_s20 + $0x8] sm:$0xff]  ;;  %v230_v17 = vld [vmem:[%s1031_s20 + $0x10] sm:$0xff] }
  0x11   : > { %843 = vmatprep.mubr.msk.f32.mxu0 %vm255_vm0, %v228_v14  ;;  %v231_v18 = vld [vmem:[%s1031_s20 + $0x18] sm:$0xff]  ;;  %v232_v19 = vld [vmem:[%s1031_s20 + $0x20] sm:$0xff]  ;;  %v233_v20 = vld [vmem:[%s1031_s20 + $0x28] sm:$0xff] }
  0x12   : > { %844 = vmatmul.mubr.msk.f32.vlgmr.msra.gmra.mrb[0].mxu0 %vm255_vm0, %v229_v15  ;;  %937 = vmatpush3.bf16.msra.mxu1 %v923_v16  ;;  %v234_v21 = vld [vmem:[%s1031_s20 + $0x30] sm:$0xff]  ;;  %v235_v22 = vld [vmem:[%s1031_s20 + $0x38] sm:$0xff]  ;;  %v236_v23 = vld [vmem:[%s1031_s20 + $0x40] sm:$0xff] }
  0x13   : > { %846 = vmatprep.mubr.msk.f32.mxu0 %vm255_vm0, %v230_v17  ;;  %918 = vmatpush3.bf16.msra.mxu0 %v915_v8  ;;  %v237_v24 = vld [vmem:[%s1031_s20 + $0x48] sm:$0xff]  ;;  %v238_v25 = vld [vmem:[%s1031_s20 + $0x50] sm:$0xff]  ;;  %v239_v26 = vld [vmem:[%s1031_s20 + $0x58] sm:$0xff] }
  0x14   : > { %920 = vmatprep.subr.bf16.mxu0 %v919_v11  ;;  %v240_v27 = vld [vmem:[%s1031_s20 + $0x60] sm:$0xff]  ;;  %v241_v28 = vld [vmem:[%s1031_s20 + $0x68] sm:$0xff]  ;;  %v242_v29 = vld [vmem:[%s1031_s20 + $0x70] sm:$0xff]  ;;  %934 = vmatprep.subr.bf16.mxu1 %v927_v33 }
  0x15   : > { %v243_v30 = vld [vmem:[%s1031_s20 + $0x78] sm:$0xff] }
  0x16   : > { %847 = vmatmul.mubr.msk.f32.gmra.mrb[2].mxu0 %vm255_vm0, %v231_v18  ;;  %938 = vmatpush3.bf16.msra.mxu1 %v927_v33 }
  0x17   : > { %849 = vmatprep.mubr.msk.f32.mxu0 %vm255_vm0, %v232_v19  ;;  %922 = vmatpush3.bf16.msra.mxu0 %v919_v11  ;;  %v772_v19 = vld [vmem:[%s1139_s4] ss:$0 sm:$0xff] }
  0x18   : > { %924 = vmatprep.subr.bf16.mxu0 %v923_v16 }
  0x1a   : > { %850 = vmatmul.mubr.msk.f32.gmra.mrb[4].mxu0 %vm255_vm0, %v233_v20 }
  0x1b   : > { %852 = vmatprep.mubr.msk.f32.mxu0 %vm255_vm0, %v234_v21  ;;  %926 = vmatpush3.bf16.msra.mxu0 %v923_v16 }
  0x1c   : > { %928 = vmatprep.subr.bf16.mxu0 %v927_v33 }
  0x1e   : > { %853 = vmatmul.mubr.msk.f32.gmra.mrb[6].mxu0 %vm255_vm0, %v235_v22 }
  0x1f   : > { %855 = vmatprep.mubr.msk.f32.mxu0 %vm255_vm0, %v236_v23  ;;  %930 = vmatpush3.bf16.msra.mxu0 %v927_v33 }
  0x22   : > { %856 = vmatmul.mubr.msk.f32.gmra.mrb[8].mxu0 %vm255_vm0, %v237_v24 }
  0x23   : > { %858 = vmatprep.mubr.msk.f32.mxu0 %vm255_vm0, %v238_v25 }
  0x26   : > { %859 = vmatmul.mubr.msk.f32.gmra.mrb[10].mxu0 %vm255_vm0, %v239_v26 }
  0x27   : > { %861 = vmatprep.mubr.msk.f32.mxu0 %vm255_vm0, %v240_v27 }
  0x2a   : > { %862 = vmatmul.mubr.msk.f32.gmra.mrb[12].mxu0 %vm255_vm0, %v241_v28 }
  0x2b   : > { %864 = vmatprep.mubr.msk.f32.mxu0 %vm255_vm0, %v242_v29 }
  0x2e   : > { %865 = vmatmul.mubr.msk.f32.gmra.mrb[14].mxu0 %vm255_vm0, %v243_v30 }
  0xe5   : > { %v845_v35 = vpop.f32.mrb[0].mxu0 }
  0xe6   : > { %v376_v36 = vadd.f32 %v845_v35, %v755_v34  ;;  %v370_v37 = vpop.f32.mrb[1].mxu0 }
  0xe7   : > { %v371_v38 = vadd.f32 %v755_v34, %v370_v37 }
  0xe8   : > { %v450_v41 = vmax.f32 %v376_v36, 0.0 }
  0xe9   : > { %v449_v39 = vmax.f32 %v371_v38, 0.0  ;;  %v848_v40 = vpop.f32.mrb[2].mxu0 }
  0xea   : > { %v386_v42 = vadd.f32 %v848_v40, %v755_v34  ;;  %v380_v43 = vpop.f32.mrb[3].mxu0 }
  0xeb   : > { %v381_v44 = vadd.f32 %v755_v34, %v380_v43  ;;  %883 = vmatprep.mubr.msk.f32.mxu0 %vm480_vm1, %v449_v39 }
  0xec   : > { %884 = vmatmul.mubr.msk.f32.vlgmr.msra.gmra.mrb[16].mxu0 %vm480_vm1, %v450_v41  ;;  %v452_v47 = vmax.f32 %v386_v42, 0.0 }
  0xed   : > { %v451_v45 = vmax.f32 %v381_v44, 0.0  ;;  %v851_v46 = vpop.f32.mrb[4].mxu0 }
  0xee   : > { %v396_v48 = vadd.f32 %v851_v46, %v755_v34  ;;  %v390_v49 = vpop.f32.mrb[5].mxu0 }
  0xef   : > { %v391_v50 = vadd.f32 %v755_v34, %v390_v49  ;;  %886 = vmatprep.mubr.msk.f32.mxu1 %vm480_vm1, %v451_v45 }
  0xf0   : > { %887 = vmatmul.mubr.msk.f32.vlgmr.msra.gmra.mrb[0].mxu1 %vm480_vm1, %v452_v47  ;;  %v454_v53 = vmax.f32 %v396_v48, 0.0 }
  0xf1   : > { %v453_v51 = vmax.f32 %v391_v50, 0.0  ;;  %v854_v52 = vpop.f32.mrb[6].mxu0 }
  0xf2   : > { %v406_v54 = vadd.f32 %v854_v52, %v755_v34  ;;  %v400_v55 = vpop.f32.mrb[7].mxu0 }
  0xf3   : > { %v401_v56 = vadd.f32 %v755_v34, %v400_v55  ;;  %889 = vmatprep.mubr.msk.f32.mxu1 %vm480_vm1, %v453_v51 }
  0xf4   : > { %890 = vmatmul.mubr.msk.f32.gmra.mrb[2].mxu1 %vm480_vm1, %v454_v53  ;;  %v456_v59 = vmax.f32 %v406_v54, 0.0 }
  0xf5   : > { %v455_v57 = vmax.f32 %v401_v56, 0.0  ;;  %v857_v58 = vpop.f32.mrb[8].mxu0 }
  0xf6   : > { %v416_v60 = vadd.f32 %v857_v58, %v755_v34  ;;  %v410_v61 = vpop.f32.mrb[9].mxu0 }
  0xf7   : > { %v411_v62 = vadd.f32 %v755_v34, %v410_v61  ;;  %892 = vmatprep.mubr.msk.f32.mxu1 %vm480_vm1, %v455_v57 }
  0xf8   : > { %893 = vmatmul.mubr.msk.f32.gmra.mrb[4].mxu1 %vm480_vm1, %v456_v59  ;;  %v458_v1 = vmax.f32 %v416_v60, 0.0 }
  0xf9   : > { %v457_v63 = vmax.f32 %v411_v62, 0.0  ;;  %v860_v0 = vpop.f32.mrb[10].mxu0 }
  0xfa   : > { %v426_v2 = vadd.f32 %v860_v0, %v755_v34  ;;  %v420_v3 = vpop.f32.mrb[11].mxu0 }
  0xfb   : > { %v421_v4 = vadd.f32 %v755_v34, %v420_v3  ;;  %895 = vmatprep.mubr.msk.f32.mxu1 %vm480_vm1, %v457_v63 }
  0xfc   : > { %896 = vmatmul.mubr.msk.f32.gmra.mrb[6].mxu1 %vm480_vm1, %v458_v1  ;;  %v460_v7 = vmax.f32 %v426_v2, 0.0 }
  0xfd   : > { %v459_v5 = vmax.f32 %v421_v4, 0.0  ;;  %v863_v6 = vpop.f32.mrb[12].mxu0 }
  0xfe   : > { %v436_v8 = vadd.f32 %v863_v6, %v755_v34  ;;  %v430_v9 = vpop.f32.mrb[13].mxu0 }
  0xff   : > { %v431_v10 = vadd.f32 %v755_v34, %v430_v9  ;;  %898 = vmatprep.mubr.msk.f32.mxu1 %vm480_vm1, %v459_v5 }
 0x100   : > { %899 = vmatmul.mubr.msk.f32.gmra.mrb[8].mxu1 %vm480_vm1, %v460_v7  ;;  %v462_v13 = vmax.f32 %v436_v8, 0.0 }
 0x101   : > { %v461_v11 = vmax.f32 %v431_v10, 0.0  ;;  %v866_v12 = vpop.f32.mrb[14].mxu0 }
 0x102   : > { %v446_v14 = vadd.f32 %v866_v12, %v755_v34  ;;  %v440_v15 = vpop.f32.mrb[15].mxu0 }
 0x103   : > { %v441_v16 = vadd.f32 %v755_v34, %v440_v15  ;;  %901 = vmatprep.mubr.msk.f32.mxu1 %vm480_vm1, %v461_v11 }
 0x104   : > { %902 = vmatmul.mubr.msk.f32.gmra.mrb[10].mxu1 %vm480_vm1, %v462_v13  ;;  %v464_v18 = vmax.f32 %v446_v14, 0.0 }
 0x105   : > { %v463_v17 = vmax.f32 %v441_v16, 0.0 }
 0x107   : > { %904 = vmatprep.mubr.msk.f32.mxu1 %vm480_vm1, %v463_v17 }
 0x108   : > { %905 = vmatmul.mubr.msk.f32.gmra.mrb[12].mxu1 %vm480_vm1, %v464_v18 }
 0x1bf   : > { %v885_v20 = vpop.f32.mrb[16].mxu0 }
 0x1c0   : > { %v601_v21 = vadd.f32 %v885_v20, %v772_v19  ;;  %v595_v22 = vpop.f32.mrb[17].mxu0 }
 0x1c1   : > { %v596_v23 = vadd.f32 %v772_v19, %v595_v22 }
 0x1c2   : > { %675 = vst.msk [vmem:[%s1098_s7 + $0x8] sm:$0xff] %vm255_vm0, %v601_v21 }
 0x1c3   : > { %674 = vst.msk [vmem:[%s1098_s7] sm:$0xff] %vm255_vm0, %v596_v23  ;;  %v888_v24 = vpop.f32.mrb[0].mxu1 }
 0x1c4   : > { %v611_v25 = vadd.f32 %v888_v24, %v772_v19  ;;  %v605_v26 = vpop.f32.mrb[1].mxu1 }
 0x1c5   : > { %v606_v27 = vadd.f32 %v772_v19, %v605_v26 }
 0x1c6   : > { %677 = vst.msk [vmem:[%s1098_s7 + $0x18] sm:$0xff] %vm255_vm0, %v611_v25 }
 0x1c7   : > { %676 = vst.msk [vmem:[%s1098_s7 + $0x10] sm:$0xff] %vm255_vm0, %v606_v27  ;;  %v891_v28 = vpop.f32.mrb[2].mxu1 }
 0x1c8   : > { %v621_v29 = vadd.f32 %v891_v28, %v772_v19  ;;  %v615_v30 = vpop.f32.mrb[3].mxu1 }
 0x1c9   : > { %v616_v31 = vadd.f32 %v772_v19, %v615_v30 }
 0x1ca   : > { %679 = vst.msk [vmem:[%s1098_s7 + $0x28] sm:$0xff] %vm255_vm0, %v621_v29 }
 0x1cb   : > { %678 = vst.msk [vmem:[%s1098_s7 + $0x20] sm:$0xff] %vm255_vm0, %v616_v31  ;;  %v894_v32 = vpop.f32.mrb[4].mxu1 }
 0x1cc   : > { %v631_v33 = vadd.f32 %v894_v32, %v772_v19  ;;  %v625_v34 = vpop.f32.mrb[5].mxu1 }
 0x1cd   : > { %v626_v35 = vadd.f32 %v772_v19, %v625_v34 }
 0x1ce   : > { %681 = vst.msk [vmem:[%s1098_s7 + $0x38] sm:$0xff] %vm255_vm0, %v631_v33 }
 0x1cf   : > { %680 = vst.msk [vmem:[%s1098_s7 + $0x30] sm:$0xff] %vm255_vm0, %v626_v35  ;;  %v897_v36 = vpop.f32.mrb[6].mxu1 }
 0x1d0   : > { %v641_v37 = vadd.f32 %v897_v36, %v772_v19  ;;  %v635_v38 = vpop.f32.mrb[7].mxu1 }
 0x1d1   : > { %v636_v39 = vadd.f32 %v772_v19, %v635_v38 }
 0x1d2   : > { %683 = vst.msk [vmem:[%s1098_s7 + $0x48] sm:$0xff] %vm255_vm0, %v641_v37 }
 0x1d3   : > { %682 = vst.msk [vmem:[%s1098_s7 + $0x40] sm:$0xff] %vm255_vm0, %v636_v39  ;;  %v900_v40 = vpop.f32.mrb[8].mxu1 }
 0x1d4   : > { %v651_v41 = vadd.f32 %v900_v40, %v772_v19  ;;  %v645_v42 = vpop.f32.mrb[9].mxu1 }
 0x1d5   : > { %v646_v43 = vadd.f32 %v772_v19, %v645_v42 }
 0x1d6   : > { %685 = vst.msk [vmem:[%s1098_s7 + $0x58] sm:$0xff] %vm255_vm0, %v651_v41 }
 0x1d7   : > { %684 = vst.msk [vmem:[%s1098_s7 + $0x50] sm:$0xff] %vm255_vm0, %v646_v43  ;;  %v903_v44 = vpop.f32.mrb[10].mxu1 }
 0x1d8   : > { %v661_v45 = vadd.f32 %v903_v44, %v772_v19  ;;  %v655_v46 = vpop.f32.mrb[11].mxu1 }
 0x1d9   : > { %v656_v47 = vadd.f32 %v772_v19, %v655_v46 }
 0x1da   : > { %687 = vst.msk [vmem:[%s1098_s7 + $0x68] sm:$0xff] %vm255_vm0, %v661_v45 }
 0x1db   : > { %686 = vst.msk [vmem:[%s1098_s7 + $0x60] sm:$0xff] %vm255_vm0, %v656_v47  ;;  %v906_v48 = vpop.f32.mrb[12].mxu1 }
 0x1dc   : > { %v671_v49 = vadd.f32 %v906_v48, %v772_v19  ;;  %v665_v50 = vpop.f32.mrb[13].mxu1 }
 0x1dd   : > { %v666_v51 = vadd.f32 %v772_v19, %v665_v50 }
 0x1de   : > { %689 = vst.msk [vmem:[%s1098_s7 + $0x78] sm:$0xff] %vm255_vm0, %v671_v49 }
 0x1df   : > { %688 = vst.msk [vmem:[%s1098_s7 + $0x70] sm:$0xff] %vm255_vm0, %v666_v51 }
 0x1e0 PF: > { %s15_s18 = sadd.s32 1, %s953_s18  }
 0x1e1   : > { %p12_p4 = scmp.ge.s32.totalorder %s15_s18, 4  }
 0x1e3   :  { %14 = sbr.rel (!%p12_p4) target bundleno = 1 (0x1), region = 70 }

</bundles_post_ra>
